<compile_context>
chip_gen: v7x
topology: tpu7x:2x2x1
jax: 0.10.0
libtpu: 0.0.40
codegen_flags: <defaults>
</compile_context>

<pallas_src>
import jax
import jax.numpy as jnp
from jax.experimental import pallas as pl
from jax.experimental.pallas import tpu as pltpu

N_PAD = 128  # lane-dense padded class dimension (last dim of the kernel output)


def _round_up(x, m):
    return (x + m - 1) // m * m


# --------------------------------------------------------------------------- #
# Kernel
# --------------------------------------------------------------------------- #
def mlp_decoder_kernel(
    x1_ref, x2_ref,
    w1a_ref, w1b_ref, b1_ref,
    w2_ref, b2_ref,
    w3_ref, b3_ref,
    w4_ref, b4_ref,
    o_ref,
):
    # Inputs stream at native dtype; cast to bf16 in-kernel (free under DMA
    # bottleneck) so the MXU runs bf16 x bf16 -> f32.
    x1 = x1_ref[...].astype(jnp.bfloat16)  # [TB, H*E]
    x2 = x2_ref[...].astype(jnp.bfloat16)  # [TB, H*E]

    # line_1 on cat([x1, x2], 1): x @ W1 == x1 @ W1a + x2 @ W1b  (f32 accumulate)
    h1 = (
        jnp.dot(x1, w1a_ref[...], preferred_element_type=jnp.float32)
        + jnp.dot(x2, w1b_ref[...], preferred_element_type=jnp.float32)
        + b1_ref[...]
    )
    h1 = jnp.maximum(h1, 0.0)  # ReLU in f32 (dropout = identity in eval)

    # line_2 + ReLU
    h2 = jnp.dot(h1.astype(jnp.bfloat16), w2_ref[...],
                 preferred_element_type=jnp.float32) + b2_ref[...]
    h2 = jnp.maximum(h2, 0.0)

    # line_3 + ReLU
    h3 = jnp.dot(h2.astype(jnp.bfloat16), w3_ref[...],
                 preferred_element_type=jnp.float32) + b3_ref[...]
    h3 = jnp.maximum(h3, 0.0)

    # line_4 + Softmax(dim=1). Padded class lanes carry bias = -1e30, so their
    # exp() underflows to 0 and the softmax over the real classes is unchanged.
    logits = jnp.dot(h3.astype(jnp.bfloat16), w4_ref[...],
                     preferred_element_type=jnp.float32) + b4_ref[...]
    m = jnp.max(logits, axis=1, keepdims=True)
    e = jnp.exp(logits - m)
    probs = e / jnp.sum(e, axis=1, keepdims=True)  # exact normalization
    o_ref[...] = probs.astype(o_ref.dtype)         # bf16 lane-dense store


# --------------------------------------------------------------------------- #
# One-time parameter packing (hoisted out of the per-call path)
# --------------------------------------------------------------------------- #
def pack_params(w1, b1, w2, b2, w3, b3, w4, b4, *, n_heads, embedding_size,
                num_classes):
    """Weights are [in, out] (transposed vs. PyTorch). Returns the tuple of
    kernel operands: W1 split into the x1/x2 halves, w4/b4 padded to 128 class
    lanes (padding bias = -1e30), weights in bf16, biases in f32."""
    H = n_heads * embedding_size
    w1a, w1b = w1[:H, :], w1[H:, :]

    w4p = jnp.pad(w4, ((0, 0), (0, N_PAD - num_classes)))
    b4p = jnp.concatenate(
        [b4.astype(jnp.float32),
         jnp.full((1, N_PAD - num_classes), -1e30, dtype=jnp.float32)], axis=1)

    w1a_b, w1b_b, w2_b, w3_b, w4_b = (
        w.astype(jnp.bfloat16) for w in (w1a, w1b, w2, w3, w4p))
    b1_f, b2_f, b3_f = (b.astype(jnp.float32) for b in (b1, b2, b3))
    return (w1a_b, w1b_b, b1_f, w2_b, b2_f, w3_b, b3_f, w4_b, b4p)


# --------------------------------------------------------------------------- #
# Wrapper
# --------------------------------------------------------------------------- #
def _choose_tile(B, block_rows):
    """Batch tile: multiple of 16, capped by block_rows, and small enough that
    large batches keep >= 4 grid steps (megacore sharding on v7x)."""
    cap = max(16, _round_up(block_rows, 16))
    target = max(16, _round_up(-(-B // 4), 16))
    return min(cap, target)


def mlp_decoder(x1, x2, packed_params, *, num_classes, block_rows=2048):
    """packed_params = output of pack_params()."""
    (w1a_b, w1b_b, b1_f, w2_b, b2_f, w3_b, b3_f, w4_b, b4_f) = packed_params
    B, H = x1.shape

    tb = _choose_tile(B, block_rows)
    b_pad = _round_up(B, tb)

    # Zero-pad the batch only if needed (padded rows stay finite through
    # softmax). No host-side dtype cast: the kernel casts to bf16 itself.
    if b_pad != B:
        x1p = jnp.pad(x1, ((0, b_pad - B), (0, 0)))
        x2p = jnp.pad(x2, ((0, b_pad - B), (0, 0)))
    else:
        x1p, x2p = x1, x2

    grid = (pl.cdiv(b_pad, tb),)

    def resident(a):  # whole array as one block, same block for every tile
        return pl.BlockSpec(a.shape, lambda i: (0,) * a.ndim)

    in_specs = [
        pl.BlockSpec((tb, H), lambda i: (i, 0)),   # x1 tile
        pl.BlockSpec((tb, H), lambda i: (i, 0)),   # x2 tile
        resident(w1a_b), resident(w1b_b), resident(b1_f),
        resident(w2_b), resident(b2_f),
        resident(w3_b), resident(b3_f),
        resident(w4_b), resident(b4_f),
    ]
    out_specs = pl.BlockSpec((tb, N_PAD), lambda i: (i, 0))

    # Scoped VMEM: 2x-buffered (x1 + x2 + bf16 out) tiles + resident params
    # + slack for in-kernel activations. Cap at 48 MiB (safe even on v7x).
    tile_bytes = 2 * (2 * tb * H * x1.dtype.itemsize + tb * N_PAD * 2)
    param_bytes = sum(int(a.size) * a.dtype.itemsize for a in packed_params)
    vmem_limit = int(min(48 << 20, tile_bytes + param_bytes + (8 << 20)))

    out_pad = pl.pallas_call(
        mlp_decoder_kernel,
        out_shape=jax.ShapeDtypeStruct((b_pad, N_PAD), jnp.bfloat16),
        grid=grid,
        in_specs=in_specs,
        out_specs=out_specs,
        compiler_params=pltpu.CompilerParams(
            dimension_semantics=("parallel",),
            vmem_limit_bytes=vmem_limit,
        ),
    )(x1p, x2p, w1a_b, w1b_b, b1_f, w2_b, b2_f, w3_b, b3_f, w4_b, b4_f)

    # Slice off padding and return f32 (module fidelity).
    return out_pad[:B, :num_classes].astype(jnp.float32)


# --------------------------------------------------------------------------- #
# Init + demo
# --------------------------------------------------------------------------- #
def init_linear(key, fan_in, fan_out):
    """PyTorch nn.Linear default init: U(-1/sqrt(fan_in), 1/sqrt(fan_in)).
    Weight returned already transposed to [fan_in, fan_out]."""
    kw, kb = jax.random.split(key)
    bound = 1.0 / (fan_in ** 0.5)
    w = jax.random.uniform(kw, (fan_in, fan_out), jnp.float32, -bound, bound)
    b = jax.random.uniform(kb, (1, fan_out), jnp.float32, -bound, bound)
    return w, b


if __name__ == "__main__":
    # args: n_heads=2, embedding_size=32, task='cls', num_classes=4, ds_dropout=0.1
    B = 2
    n_heads = 2
    E = 32
    num_classes = 4
    in_dim = 2 * n_heads * E  # 128 (cat of two [B, n_heads*E] inputs)

    key = jax.random.PRNGKey(0)
    k_x1, k_x2, k1, k2, k3, k4 = jax.random.split(key, 6)

    x1 = jax.random.normal(k_x1, (B, n_heads * E), jnp.float32)
    x2 = jax.random.normal(k_x2, (B, n_heads * E), jnp.float32)

    w1, b1 = init_linear(k1, in_dim, E)
    w2, b2 = init_linear(k2, E, E // 4)
    w3, b3 = init_linear(k3, E // 4, E // 8)
    w4, b4 = init_linear(k4, E // 8, num_classes)

    # One-time parameter packing (not part of the per-call path).
    packed = pack_params(w1, b1, w2, b2, w3, b3, w4, b4,
                         n_heads=n_heads, embedding_size=E,
                         num_classes=num_classes)

    out = mlp_decoder(x1, x2, packed, num_classes=num_classes)
    jax.block_until_ready(out)

    # Pure-JAX f32 reference (true module semantics).
    def reference(a, b):
        x = jnp.concatenate([a, b], axis=1)
        h1 = jax.nn.relu(x @ w1 + b1)
        h2 = jax.nn.relu(h1 @ w2 + b2)
        h3 = jax.nn.relu(h2 @ w3 + b3)
        return jax.nn.softmax(h3 @ w4 + b4, axis=1)

    expected = reference(x1, x2)

    assert out.shape == (B, num_classes), out.shape
    # bf16 weight/activation/output rounding -> generous but meaningful tol.
    assert bool(jnp.allclose(out, expected, atol=2e-2)), (out, expected)
    row_sums = jnp.sum(out, axis=1)
    assert bool(jnp.allclose(row_sums, 1.0, atol=2e-2)), row_sums

    print("KERNEL_OK")
</pallas_src>

<mosaic_0001>
module attributes {stable_mosaic.version = 11 : i64} {
  func.func @mlp_decoder_kernel(%arg0: i32, %arg1: memref<16x64xf32, #tpu.memory_space<vmem>>, %arg2: memref<16x64xf32, #tpu.memory_space<vmem>>, %arg3: memref<64x32xbf16, #tpu.memory_space<vmem>>, %arg4: memref<64x32xbf16, #tpu.memory_space<vmem>>, %arg5: memref<1x32xf32, #tpu.memory_space<vmem>>, %arg6: memref<32x8xbf16, #tpu.memory_space<vmem>>, %arg7: memref<1x8xf32, #tpu.memory_space<vmem>>, %arg8: memref<8x4xbf16, #tpu.memory_space<vmem>>, %arg9: memref<1x4xf32, #tpu.memory_space<vmem>>, %arg10: memref<4x128xbf16, #tpu.memory_space<vmem>>, %arg11: memref<1x128xf32, #tpu.memory_space<vmem>>, %arg12: memref<16x128xbf16, #tpu.memory_space<vmem>>) attributes {dimension_semantics = [#tpu.dimension_semantics<parallel>], iteration_bounds = array<i64: 1>, scalar_prefetch = 0 : i64, scratch_operands = 0 : i64, tpu.core_type = #tpu.core_type<tc>, window_params = [{transform_indices = @transform_0, window_bounds = array<i64: 16, 64>}, {transform_indices = @transform_1, window_bounds = array<i64: 16, 64>}, {pipeline_mode = #tpu.pipeline_mode<synchronous>, transform_indices = @transform_2, window_bounds = array<i64: 64, 32>}, {pipeline_mode = #tpu.pipeline_mode<synchronous>, transform_indices = @transform_3, window_bounds = array<i64: 64, 32>}, {pipeline_mode = #tpu.pipeline_mode<synchronous>, transform_indices = @transform_4, window_bounds = array<i64: 1, 32>}, {pipeline_mode = #tpu.pipeline_mode<synchronous>, transform_indices = @transform_5, window_bounds = array<i64: 32, 8>}, {pipeline_mode = #tpu.pipeline_mode<synchronous>, transform_indices = @transform_6, window_bounds = array<i64: 1, 8>}, {pipeline_mode = #tpu.pipeline_mode<synchronous>, transform_indices = @transform_7, window_bounds = array<i64: 8, 4>}, {pipeline_mode = #tpu.pipeline_mode<synchronous>, transform_indices = @transform_8, window_bounds = array<i64: 1, 4>}, {pipeline_mode = #tpu.pipeline_mode<synchronous>, transform_indices = @transform_9, window_bounds = array<i64: 4, 128>}, {pipeline_mode = #tpu.pipeline_mode<synchronous>, transform_indices = @transform_10, window_bounds = array<i64: 1, 128>}, {transform_indices = @transform_11, window_bounds = array<i64: 16, 128>}]} {
    %c0 = arith.constant 0 : index
    %c0_0 = arith.constant 0 : index
    %0 = vector.load %arg1[%c0, %c0_0] : memref<16x64xf32, #tpu.memory_space<vmem>>, vector<16x64xf32>
    %1 = arith.truncf %0 : vector<16x64xf32> to vector<16x64xbf16>
    %c0_1 = arith.constant 0 : index
    %c0_2 = arith.constant 0 : index
    %2 = vector.load %arg2[%c0_1, %c0_2] : memref<16x64xf32, #tpu.memory_space<vmem>>, vector<16x64xf32>
    %3 = arith.truncf %2 : vector<16x64xf32> to vector<16x64xbf16>
    %c0_3 = arith.constant 0 : index
    %c0_4 = arith.constant 0 : index
    %4 = vector.load %arg3[%c0_3, %c0_4] : memref<64x32xbf16, #tpu.memory_space<vmem>>, vector<64x32xbf16>
    %cst = arith.constant dense<0.000000e+00> : vector<16x32xf32>
    %5 = tpu.matmul %1, %4, %cst {dimension_numbers = #tpu.dot_dimension_numbers<[1], [0], [0], [1], [0, 0, 1, 1], [], []>} : vector<16x64xbf16>, vector<64x32xbf16>, vector<16x32xf32> -> vector<16x32xf32>
    %c0_5 = arith.constant 0 : index
    %c0_6 = arith.constant 0 : index
    %6 = vector.load %arg4[%c0_5, %c0_6] : memref<64x32xbf16, #tpu.memory_space<vmem>>, vector<64x32xbf16>
    %cst_7 = arith.constant dense<0.000000e+00> : vector<16x32xf32>
    %7 = tpu.matmul %3, %6, %cst_7 {dimension_numbers = #tpu.dot_dimension_numbers<[1], [0], [0], [1], [0, 0, 1, 1], [], []>} : vector<16x64xbf16>, vector<64x32xbf16>, vector<16x32xf32> -> vector<16x32xf32>
    %8 = arith.addf %5, %7 : vector<16x32xf32>
    %c0_8 = arith.constant 0 : index
    %c0_9 = arith.constant 0 : index
    %9 = vector.load %arg5[%c0_8, %c0_9] : memref<1x32xf32, #tpu.memory_space<vmem>>, vector<1x32xf32>
    %10 = vector.broadcast %9 : vector<1x32xf32> to vector<16x32xf32>
    %11 = arith.addf %8, %10 : vector<16x32xf32>
    %cst_10 = arith.constant 0.000000e+00 : f32
    %12 = vector.broadcast %cst_10 : f32 to vector<16x32xf32>
    %13 = arith.maximumf %11, %12 : vector<16x32xf32>
    %14 = arith.truncf %13 : vector<16x32xf32> to vector<16x32xbf16>
    %c0_11 = arith.constant 0 : index
    %c0_12 = arith.constant 0 : index
    %15 = vector.load %arg6[%c0_11, %c0_12] : memref<32x8xbf16, #tpu.memory_space<vmem>>, vector<32x8xbf16>
    %cst_13 = arith.constant dense<0.000000e+00> : vector<16x8xf32>
    %16 = tpu.matmul %14, %15, %cst_13 {dimension_numbers = #tpu.dot_dimension_numbers<[1], [0], [0], [1], [0, 0, 1, 1], [], []>} : vector<16x32xbf16>, vector<32x8xbf16>, vector<16x8xf32> -> vector<16x8xf32>
    %c0_14 = arith.constant 0 : index
    %c0_15 = arith.constant 0 : index
    %17 = vector.load %arg7[%c0_14, %c0_15] : memref<1x8xf32, #tpu.memory_space<vmem>>, vector<1x8xf32>
    %18 = vector.broadcast %17 : vector<1x8xf32> to vector<16x8xf32>
    %19 = arith.addf %16, %18 : vector<16x8xf32>
    %cst_16 = arith.constant 0.000000e+00 : f32
    %20 = vector.broadcast %cst_16 : f32 to vector<16x8xf32>
    %21 = arith.maximumf %19, %20 : vector<16x8xf32>
    %22 = arith.truncf %21 : vector<16x8xf32> to vector<16x8xbf16>
    %c0_17 = arith.constant 0 : index
    %c0_18 = arith.constant 0 : index
    %23 = vector.load %arg8[%c0_17, %c0_18] : memref<8x4xbf16, #tpu.memory_space<vmem>>, vector<8x4xbf16>
    %cst_19 = arith.constant dense<0.000000e+00> : vector<16x4xf32>
    %24 = tpu.matmul %22, %23, %cst_19 {dimension_numbers = #tpu.dot_dimension_numbers<[1], [0], [0], [1], [0, 0, 1, 1], [], []>} : vector<16x8xbf16>, vector<8x4xbf16>, vector<16x4xf32> -> vector<16x4xf32>
    %c0_20 = arith.constant 0 : index
    %c0_21 = arith.constant 0 : index
    %25 = vector.load %arg9[%c0_20, %c0_21] : memref<1x4xf32, #tpu.memory_space<vmem>>, vector<1x4xf32>
    %26 = vector.broadcast %25 : vector<1x4xf32> to vector<16x4xf32>
    %27 = arith.addf %24, %26 : vector<16x4xf32>
    %cst_22 = arith.constant 0.000000e+00 : f32
    %28 = vector.broadcast %cst_22 : f32 to vector<16x4xf32>
    %29 = arith.maximumf %27, %28 : vector<16x4xf32>
    %30 = arith.truncf %29 : vector<16x4xf32> to vector<16x4xbf16>
    %c0_23 = arith.constant 0 : index
    %c0_24 = arith.constant 0 : index
    %31 = vector.load %arg10[%c0_23, %c0_24] : memref<4x128xbf16, #tpu.memory_space<vmem>>, vector<4x128xbf16>
    %cst_25 = arith.constant dense<0.000000e+00> : vector<16x128xf32>
    %32 = tpu.matmul %30, %31, %cst_25 {dimension_numbers = #tpu.dot_dimension_numbers<[1], [0], [0], [1], [0, 0, 1, 1], [], []>} : vector<16x4xbf16>, vector<4x128xbf16>, vector<16x128xf32> -> vector<16x128xf32>
    %c0_26 = arith.constant 0 : index
    %c0_27 = arith.constant 0 : index
    %33 = vector.load %arg11[%c0_26, %c0_27] : memref<1x128xf32, #tpu.memory_space<vmem>>, vector<1x128xf32>
    %34 = vector.broadcast %33 : vector<1x128xf32> to vector<16x128xf32>
    %35 = arith.addf %32, %34 : vector<16x128xf32>
    %cst_28 = arith.constant dense<0xFF800000> : vector<16xf32>
    %36 = vector.multi_reduction <maximumf>, %35, %cst_28 [1] : vector<16x128xf32> to vector<16xf32>
    %37 = vector.shape_cast %36 : vector<16xf32> to vector<16x1xf32>
    %38 = vector.broadcast %37 : vector<16x1xf32> to vector<16x128xf32>
    %39 = arith.subf %35, %38 : vector<16x128xf32>
    %40 = math.exp %39 : vector<16x128xf32>
    %cst_29 = arith.constant dense<0.000000e+00> : vector<16xf32>
    %41 = vector.multi_reduction <add>, %40, %cst_29 [1] : vector<16x128xf32> to vector<16xf32>
    %42 = vector.shape_cast %41 : vector<16xf32> to vector<16x1xf32>
    %43 = vector.broadcast %42 : vector<16x1xf32> to vector<16x128xf32>
    %44 = arith.divf %40, %43 : vector<16x128xf32>
    %45 = arith.truncf %44 : vector<16x128xf32> to vector<16x128xbf16>
    %c0_30 = arith.constant 0 : index
    %c0_31 = arith.constant 0 : index
    %46 = vector.load %arg12[%c0_30, %c0_31] : memref<16x128xbf16, #tpu.memory_space<vmem>>, vector<16x128xbf16>
    tpu.vector_store %arg12[%c0_30, %c0_31], %45 {strides = array<i32>} : memref<16x128xbf16, #tpu.memory_space<vmem>>, vector<16x128xbf16>,
    return
  }
  func.func @transform_0(%arg0: i32) -> (i32, i32) {
    %c0_i32 = arith.constant 0 : i32
    %c0_i32_0 = arith.constant 0 : i32
    return %arg0, %c0_i32 : i32, i32
  }
  func.func @transform_1(%arg0: i32) -> (i32, i32) {
    %c0_i32 = arith.constant 0 : i32
    %c0_i32_0 = arith.constant 0 : i32
    return %arg0, %c0_i32 : i32, i32
  }
  func.func @transform_2(%arg0: i32) -> (i32, i32) {
    %c0_i32 = arith.constant 0 : i32
    %c0_i32_0 = arith.constant 0 : i32
    %c0_i32_1 = arith.constant 0 : i32
    return %c0_i32, %c0_i32_0 : i32, i32
  }
  func.func @transform_3(%arg0: i32) -> (i32, i32) {
    %c0_i32 = arith.constant 0 : i32
    %c0_i32_0 = arith.constant 0 : i32
    %c0_i32_1 = arith.constant 0 : i32
    return %c0_i32, %c0_i32_0 : i32, i32
  }
  func.func @transform_4(%arg0: i32) -> (i32, i32) {
    %c0_i32 = arith.constant 0 : i32
    %c0_i32_0 = arith.constant 0 : i32
    %c0_i32_1 = arith.constant 0 : i32
    return %c0_i32, %c0_i32_0 : i32, i32
  }
  func.func @transform_5(%arg0: i32) -> (i32, i32) {
    %c0_i32 = arith.constant 0 : i32
    %c0_i32_0 = arith.constant 0 : i32
    %c0_i32_1 = arith.constant 0 : i32
    return %c0_i32, %c0_i32_0 : i32, i32
  }
  func.func @transform_6(%arg0: i32) -> (i32, i32) {
    %c0_i32 = arith.constant 0 : i32
    %c0_i32_0 = arith.constant 0 : i32
    %c0_i32_1 = arith.constant 0 : i32
    return %c0_i32, %c0_i32_0 : i32, i32
  }
  func.func @transform_7(%arg0: i32) -> (i32, i32) {
    %c0_i32 = arith.constant 0 : i32
    %c0_i32_0 = arith.constant 0 : i32
    %c0_i32_1 = arith.constant 0 : i32
    return %c0_i32, %c0_i32_0 : i32, i32
  }
  func.func @transform_8(%arg0: i32) -> (i32, i32) {
    %c0_i32 = arith.constant 0 : i32
    %c0_i32_0 = arith.constant 0 : i32
    %c0_i32_1 = arith.constant 0 : i32
    return %c0_i32, %c0_i32_0 : i32, i32
  }
  func.func @transform_9(%arg0: i32) -> (i32, i32) {
    %c0_i32 = arith.constant 0 : i32
    %c0_i32_0 = arith.constant 0 : i32
    %c0_i32_1 = arith.constant 0 : i32
    return %c0_i32, %c0_i32_0 : i32, i32
  }
  func.func @transform_10(%arg0: i32) -> (i32, i32) {
    %c0_i32 = arith.constant 0 : i32
    %c0_i32_0 = arith.constant 0 : i32
    %c0_i32_1 = arith.constant 0 : i32
    return %c0_i32, %c0_i32_0 : i32, i32
  }
  func.func @transform_11(%arg0: i32) -> (i32, i32) {
    %c0_i32 = arith.constant 0 : i32
    %c0_i32_0 = arith.constant 0 : i32
    return %arg0, %c0_i32 : i32, i32
  }
}

</mosaic_0001>

<bundles_post_ra>
// kernel: tpu_custom_call.1
= control target key start
LH: loop header
LB: loop body
LE: loop exit
PB: predicated region body
PF: predicated region fallthrough
CT: control target
= control target key end

     0   :  { %v579_v1 = vmov 0.0   ;;  %vm580_vm0 = vmmov 0   ;;  %s738_s0 = inlined_call_operand.vmem [shape: f32[16,64], index: 0, kind: input, shape index: {}]   ;;  %s739_s1 = inlined_call_operand.vmem [shape: f32[16,64], index: 1, kind: input, shape index: {}]   ;;  %s740_s2 = inlined_call_operand.vmem [shape: bf16[64,32], index: 2, kind: input, shape index: {}]   ;;  %s741_s3 = inlined_call_operand.vmem [shape: bf16[64,32], index: 3, kind: input, shape index: {}]   ;;  %s742_s4 = inlined_call_operand.vmem [shape: f32[1,32], index: 4, kind: input, shape index: {}]   ;;  %s743_s5 = inlined_call_operand.vmem [shape: bf16[32,8], index: 5, kind: input, shape index: {}]   ;;  %s744_s6 = inlined_call_operand.vmem [shape: f32[1,8], index: 6, kind: input, shape index: {}]   ;;  %s745_s7 = inlined_call_operand.vmem [shape: bf16[8,4], index: 7, kind: input, shape index: {}]   ;;  %s746_s8 = inlined_call_operand.vmem [shape: f32[1,4], index: 8, kind: input, shape index: {}]   ;;  %s747_s9 = inlined_call_operand.vmem [shape: bf16[4,128], index: 9, kind: input, shape index: {}]   ;;  %s748_s10 = inlined_call_operand.vmem [shape: f32[1,128], index: 10, kind: input, shape index: {}]   ;;  %s749_s11 = inlined_call_operand.hbm [shape: bf16[16,128], index: 11, kind: output, shape index: {}]  }
   0x1   :  { %v537_v0 = vld [vmem:[%s741_s3] sm:$0xff]   ;;  %488 = vmatprep.subr.bf16.mxu0 %v579_v1  ;;  %500 = vmatprep.subr.bf16.mxu1 %v579_v1  ;;  %v539_v3 = vld [vmem:[%s741_s3 + $0x8] sm:$0xff]   ;;  %v541_v5 = vld [vmem:[%s741_s3 + $0x10] sm:$0xff]  }
   0x2   :  { %v538_v2 = vld [vmem:[%s740_s2] sm:$0xff]   ;;  %489 = vmatpush3.bf16.msra.mxu0 %v537_v0  ;;  %496 = vmatprep.mubr.msk.bf16.mxu0 %vm580_vm0, %v579_v1  ;;  %v540_v4 = vld [vmem:[%s740_s2 + $0x8] sm:$0xff]   ;;  %v542_v6 = vld [vmem:[%s740_s2 + $0x10] sm:$0xff]  }
   0x3   :  { %501 = vmatpush3.bf16.msra.mxu1 %v538_v2  ;;  %490 = vmatprep.subr.bf16.mxu0 %v579_v1  ;;  %v543_v7 = vld [vmem:[%s741_s3 + $0x18] sm:$0xff]   ;;  %v43_v8 = vld [vmem:[%s739_s1] sm:$0xff]  ;;  %v44_v9 = vld [vmem:[%s739_s1 + $0x8] sm:$0xff] }
   0x4   :  { %502 = vmatprep.subr.bf16.mxu1 %v579_v1  ;;  %508 = vmatprep.mubr.msk.bf16.mxu1 %vm580_vm0, %v579_v1 }
   0x6   :  { %491 = vmatpush3.bf16.msra.mxu0 %v539_v3 }
   0x7   :  { %503 = vmatpush3.bf16.msra.mxu1 %v540_v4  ;;  %492 = vmatprep.subr.bf16.mxu0 %v579_v1 }
   0x8   :  { %504 = vmatprep.subr.bf16.mxu1 %v579_v1 }
   0xa   :  { %493 = vmatpush3.bf16.msra.mxu0 %v541_v5 }
   0xb   :  { %16 = vsyncpa [#allocation3], 0  ;;  %505 = vmatpush3.bf16.msra.mxu1 %v542_v6  ;;  %494 = vmatprep.subr.bf16.mxu0 %v579_v1  ;;  %v544_v10 = vld [vmem:[%s740_s2 + $0x18] sm:$0xff]   ;;  %v40_v11 = vld [vmem:[%s738_s0] sm:$0xff]  ;;  %v45_v13 = vpack.c.bf16 %v44_v9, %v43_v8  ;;  %vm86_vm1 = vcmask 523264   ;;  %vm234_vm2 = vcmask 261120  }
   0xc   :  { %v41_v12 = vld [vmem:[%s738_s0 + $0x8] sm:$0xff]  ;;  %506 = vmatprep.subr.bf16.mxu1 %v579_v1  ;;  %v545_v15 = vld [vmem:[%s743_s5] sm:$0xff]   ;;  %vm294_vm3 = vcmask 1043456   ;;  %vm290_vm4 = vcmask 64512   ;;  %vm354_vm5 = vcmask 1041408   ;;  %vm350_vm6 = vcmask 31744  }
   0xd   :  { %v42_v14 = vpack.c.bf16 %v41_v12, %v40_v11  ;;  %v546_v16 = vld [vmem:[%s743_s5 + $0x8] sm:$0xff]   ;;  %v453_v19 = vld [vmem:[%s742_s4] ss:$0 sm:$0xff] }
   0xe   :  { %495 = vmatpush3.bf16.msra.mxu0 %v543_v7  ;;  %v282_v33 = vld [vmem:[%s745_s7] sm:$0xf] }
   0xf   :  { %507 = vmatpush3.bf16.msra.mxu1 %v544_v10  ;;  %512 = vmatprep.subr.bf16.mxu0 %v579_v1  ;;  %v296_v34 = vsel %vm294_vm3, %v282_v33, 0  ;;  %v454_v35 = vld [vmem:[%s744_s6] ss:$0 sm:$0xff] }
  0x10   :  { %520 = vmatprep.subr.bf16.mxu1 %v579_v1  ;;  %v342_v45 = vld [vmem:[%s747_s9] sm:$0x3] }
  0x11   :  { %497 = vmatmul.mubr.msk.bf16.vlgmr.msra.gmra.mrb[0].mxu0 %vm86_vm1, %v45_v13  ;;  %v356_v46 = vsel %vm354_vm5, %v342_v45, 0  ;;  %v458_v47 = vld [vmem:[%s746_s8] ss:$0 sm:$0xff]  ;;  %s581_s8 = smov [#allocation2]  }
  0x12   :  { %509 = vmatmul.mubr.msk.bf16.vlgmr.msra.gmra.mrb[0].mxu1 %vm86_vm1, %v42_v14  ;;  %516 = vmatprep.mubr.msk.bf16.mxu0 %vm580_vm0, %v579_v1  ;;  %v460_v57 = vld [vmem:[%s748_s10] ss:$0 sm:$0xff]  ;;  %s432_s10 = sshll.u32 %s581_s8, 4  ;;  %s433_s10 = int_to_ptr.vmem [resolvable:$true] %s432_s10 }
  0x13   :  { %522 = vmatprep.mubr.msk.bf16.mxu1 %vm580_vm0, %v579_v1  ;;  %513 = vmatpush3.bf16.msra.mxu0 %v545_v15  ;;  %s555_s29 = scalar_lea.vmem %s433_s10, 128  ;;  %p560_p1 = scmp.lt.s32.totalorder %s433_s10, %s433_s10 }
  0x14   :  { %514 = vmatprep.subr.bf16.mxu0 %v579_v1  ;;  %521 = vmatpush3.bf16.msra.mxu1 %v296_v34  ;;  %p556_p0 = scmp.ne.s32.totalorder %s433_s10, %s555_s29  ;;  %p561_p2 = scmp.lt.s32.totalorder %s555_s29, %s555_s29 }
  0x16   :  { %p562_p3 = por %p561_p2, %p560_p1 }
  0x17   :  { %515 = vmatpush3.bf16.msra.mxu0 %v546_v16 }
  0x18   :  { %526 = vmatprep.subr.bf16.mxu0 %v579_v1  ;;  %p563_p4 = pnand %p562_p3, %p556_p0 }
  0xe4   :  { %v124_v17 = vpop.f32.mrb[0].mxu0 }
  0xe5   :  { %v192_v18 = vpop.f32.mrb[0].mxu1  ;;  %v498_v20 = vpop.f32.mrb[1].mxu0 }
  0xe6   :  { %v193_v21 = vadd.f32 %v192_v18, %v124_v17  ;;  %v510_v22 = vpop.f32.mrb[1].mxu1  ;;  %v127_v23 = vpop.f32.mrb[2].mxu0 }
  0xe7   :  { %v195_v24 = vpop.f32.mrb[2].mxu1  ;;  %v499_v25 = vpop.f32.mrb[3].mxu0 }
  0xe8   :  { %v206_v26 = vadd.f32 %v453_v19, %v193_v21  ;;  %v196_v27 = vadd.f32 %v195_v24, %v127_v23  ;;  %v511_v28 = vpop.f32.mrb[3].mxu1 }
  0xea   :  { %v207_v29 = vadd.f32 %v453_v19, %v196_v27  ;;  %v208_v30 = vmax.f32 %v206_v26, 0.0 }
  0xec   :  { %v209_v31 = vmax.f32 %v207_v29, 0.0 }
  0xee   :  { %v210_v32 = vpack.c.bf16 %v209_v31, %v208_v30 }
  0xf0   :  { %517 = vmatmul.mubr.msk.bf16.vlgmr.msra.gmra.mrb[4].mxu0 %vm234_vm2, %v210_v32 }
  0xf1   :  { %528 = vmatprep.mubr.msk.bf16.mxu0 %vm580_vm0, %v579_v1  ;;  %527 = vmatpush3.bf16.msra.mxu0 %v356_v46 }
 0x1c3   :  { %v272_v36 = vpop.f32.mrb[4].mxu0 }
 0x1c4   :  { %v273_v37 = vadd.f32 %v454_v35, %v272_v36  ;;  %v518_v38 = vpop.f32.mrb[5].mxu0 }
 0x1c5   :  { %v275_v39 = vpop.f32.mrb[6].mxu0 }
 0x1c6   :  { %v276_v40 = vadd.f32 %v454_v35, %v275_v39  ;;  %v519_v41 = vpop.f32.mrb[7].mxu0  ;;  %v279_v42 = vmax.f32 %v273_v37, 0.0 }
 0x1c8   :  { %v280_v43 = vmax.f32 %v276_v40, 0.0 }
 0x1ca   :  { %v281_v44 = vpack.c.bf16 %v280_v43, %v279_v42 }
 0x1cc   :  { %523 = vmatmul.mubr.msk.bf16.vlgmr.msra.gmra.mrb[4].mxu1 %vm290_vm4, %v281_v44 }
 0x29f   :  { %v332_v48 = vpop.f32.mrb[4].mxu1 }
 0x2a0   :  { %v333_v49 = vadd.f32 %v458_v47, %v332_v48  ;;  %v524_v50 = vpop.f32.mrb[5].mxu1 }
 0x2a1   :  { %v335_v51 = vpop.f32.mrb[6].mxu1 }
 0x2a2   :  { %v336_v52 = vadd.f32 %v458_v47, %v335_v51  ;;  %v525_v53 = vpop.f32.mrb[7].mxu1  ;;  %v339_v54 = vmax.f32 %v333_v49, 0.0 }
 0x2a4   :  { %v340_v55 = vmax.f32 %v336_v52, 0.0 }
 0x2a6   :  { %v341_v56 = vpack.c.bf16 %v340_v55, %v339_v54 }
 0x2a8   :  { %529 = vmatmul.mubr.msk.bf16.vlgmr.msra.gmra.mrb[8].mxu0 %vm350_vm6, %v341_v56 }
 0x37b   :  { %v392_v58 = vpop.f32.mrb[8].mxu0 }
 0x37c   :  { %v393_v59 = vadd.f32 %v460_v57, %v392_v58  ;;  %v530_v60 = vpop.f32.mrb[9].mxu0 }
 0x37d   :  { %v395_v61 = vpop.f32.mrb[10].mxu0 }
 0x37e   :  { %399 = vmax.xlane.f32.xlu0 %v393_v59  ;;  %v531_v62 = vpop.f32.mrb[11].mxu0  ;;  %v396_v63 = vadd.f32 %v460_v57, %v395_v61 }
 0x382   :  { %401 = vmax.xlane.f32.xlu0 %v396_v63 }
 0x40b   :  { %v400_v0 = vpop.xlane.xlu0 %399 }
 0x40c   :  { %v403_v1 = vsub.f32 %v393_v59, %v400_v0 }
 0x40e   :  { %v405_v2 = vmul.f32 1.442695, %v403_v1 }
 0x40f   :  { %v402_v3 = vpop.xlane.xlu0 %401 }
 0x410   :  { %547 = vpow2.f32 %v405_v2  ;;  %v404_v4 = vsub.f32 %v396_v63, %v402_v3 }
 0x412   :  { %v407_v5 = vmul.f32 1.442695, %v404_v4 }
 0x414   :  { %549 = vpow2.f32 %v407_v5 }
 0x41a   :  { %v548_v6 = vpop.eup %547 }
 0x41b   :  { %409 = vadd.xlane.f32.xlu1 %v548_v6 }
 0x41e   :  { %v550_v7 = vpop.eup %549 }
 0x41f   :  { %411 = vadd.xlane.f32.xlu1 %v550_v7 }
 0x4a8   :  { %v410_v8 = vpop.xlane.xlu1 %409 }
 0x4a9   :  { %551 = vrcp.f32 %v410_v8 }
 0x4ac   :  { %v412_v9 = vpop.xlane.xlu1 %411 }
 0x4ad   :  { %553 = vrcp.f32 %v412_v9 }
 0x4b3   :  { %v552_v10 = vpop.eup %551 }
 0x4b4   :  { %v414_v12 = vmul.f32 %v552_v10, %v548_v6 }
 0x4b7   :  { %v554_v11 = vpop.eup %553 }
 0x4b8   :  { %v416_v13 = vmul.f32 %v554_v11, %v550_v7 }
 0x4ba   :  { %v469_v14 = vpack.c.bf16 %v416_v13, %v414_v12 }
 0x4bc   :  { %470 = vst [vmem:[#allocation2] sm:$0xff] %v469_v14  }
 0x4bd   :  { %566 = shalt.err (!%p563_p4)
}
 0x4be   :  { %s567_s13 = scalar_lea.hbm %s749_s11, 128 }
 0x4bf   :  { %p568_p5 = scmp.ne.s32.totalorder %s749_s11, %s567_s13  ;;  %p571_p6 = scmp.lt.u32.totalorder %s567_s13, %s749_s11 }
 0x4c1   :  { %p573_p7 = pnand %p571_p6, %p568_p5 }
 0x4c3   :  { %576 = shalt.err (!%p573_p7)
}
 0x4c4   :  { %s582_s18 = smov 64   ;;  %s583_s19 = smov 4  }
 0x4c5   :  { %438 = dma.vmem_to_hbm [thread:$0]  %s433_s10, 128, %s749_s11, [#allocation3], %s582_s18, %s582_s18, %s583_s19  }
 0x4c6   :  { %577 = dma.done.wait [#allocation3], 128  }
 0x4c7   :  { %578 = vsyncadd [#allocation3], 4294967168 }
 0x4c8   :  { %442 = vsyncpa [#allocation3], 1 }

</bundles_post_ra>
